<compile_context>
chip_gen: v6e
topology: v6e:2x2x1
jax: 0.10.0
libtpu: 0.0.40
codegen_flags: <defaults>
</compile_context>

<pallas_src>
import math

import jax
import jax.numpy as jnp
from jax.experimental import pallas as pl
from jax.experimental.pallas import tpu as pltpu

LANE = 128
SUBLANE_BF16 = 16   # bf16 packs 16 sublanes per vreg; keep M tiles 16-aligned


def _round_up(x, m):
    return (x + m - 1) // m * m


def _cdiv(a, b):
    return (a + b - 1) // b


# ----------------------------------------------------------------------------
# Pallas kernel bodies
# ----------------------------------------------------------------------------
def _conv_compute(p_ref, w_ref, aff_ref, b_ref, *, activation):
    # p_ref: (TM, KKCp) bf16 | w_ref: (KKCp, Cp) bf16
    # aff_ref: (2, KKCp) f32 deferred BN scale/shift | b_ref: (1, Cp) f32 bias
    p = p_ref[...]
    if aff_ref is not None:
        # Deferred BatchNorm affine + LeakyReLU(0.2) from the producer layer,
        # applied per patch column (column order = (kh, kw, cin)).
        pf = p.astype(jnp.float32) * aff_ref[0:1, :] + aff_ref[1:2, :]
        pf = jnp.where(pf > 0, pf, 0.2 * pf)
        p = pf.astype(jnp.bfloat16)
    acc = jnp.dot(p, w_ref[...], preferred_element_type=jnp.float32)
    if b_ref is not None:
        acc = acc + b_ref[...]
    if activation == "leaky":               # nn.LeakyReLU(0.2)
        acc = jnp.where(acc > 0, acc, 0.2 * acc)
    elif activation == "sigmoid":           # nn.Sigmoid (EUP-routed reciprocal)
        acc = pl.reciprocal(1.0 + jnp.exp(-acc), approx=True)
    # activation == "none": identity
    return acc


def _store_stats(stats_ref, acc, *, tile_m, m_total):
    # Mask rows past the true M so padded rows (which can be non-zero when a
    # deferred affine ran in the prologue) never pollute the BN statistics.
    row = jax.lax.broadcasted_iota(jnp.int32, acc.shape, 0)
    valid = (row + pl.program_id(0) * tile_m) < m_total
    a = jnp.where(valid, acc, 0.0)
    stats_ref[0:1, :] = jnp.sum(a, axis=0, keepdims=True)       # per-tile sum
    stats_ref[1:2, :] = jnp.sum(a * a, axis=0, keepdims=True)   # per-tile sumsq


def _make_conv_kernel(*, has_in_affine, use_bn, activation, tile_m, m_total):
    """Builds a kernel with a fixed positional signature for the given layer."""
    if not use_bn:
        if has_in_affine:
            def kernel(p_ref, w_ref, aff_ref, b_ref, o_ref):
                acc = _conv_compute(p_ref, w_ref, aff_ref, b_ref,
                                    activation=activation)
                o_ref[...] = acc.astype(o_ref.dtype)
        else:
            def kernel(p_ref, w_ref, b_ref, o_ref):
                acc = _conv_compute(p_ref, w_ref, None, b_ref,
                                    activation=activation)
                o_ref[...] = acc.astype(o_ref.dtype)
    else:
        # BN layer: conv bias is skipped (it cancels under mean subtraction);
        # the affine + LeakyReLU is deferred into the consumer layer.
        if has_in_affine:
            def kernel(p_ref, w_ref, aff_ref, o_ref, stats_ref):
                acc = _conv_compute(p_ref, w_ref, aff_ref, None,
                                    activation="none")
                o_ref[...] = acc.astype(o_ref.dtype)
                _store_stats(stats_ref, acc, tile_m=tile_m, m_total=m_total)
        else:
            def kernel(p_ref, w_ref, o_ref, stats_ref):
                acc = _conv_compute(p_ref, w_ref, None, None,
                                    activation="none")
                o_ref[...] = acc.astype(o_ref.dtype)
                _store_stats(stats_ref, acc, tile_m=tile_m, m_total=m_total)
    return kernel


# ----------------------------------------------------------------------------
# One conv layer = Conv2d(of, nf, 5, 2, 2) [+ BN] [+ act]
#
# Returns (output, deferred_affine).  For BN layers the output is the raw conv
# result (pre-affine, bf16) and deferred_affine = (scale, shift) per channel;
# the consumer layer applies scale/shift + LeakyReLU in its GEMM prologue.
# ----------------------------------------------------------------------------
def conv_layer(x_nhwc, w_hwio, b, gamma, beta, *, stride=2, pad=2,
               use_bn=False, activation="leaky", in_affine=None,
               out_dtype=jnp.bfloat16, eps=1e-5, tile_m_max=512):
    N, H, W, Cin = x_nhwc.shape
    K = w_hwio.shape[0]
    Cout = w_hwio.shape[-1]
    Ho = (H + 2 * pad - K) // stride + 1
    Wo = (W + 2 * pad - K) // stride + 1
    M = N * Ho * Wo
    KKC = K * K * Cin

    # --- glue: pad + im2col in bf16 (patch element order = (kh, kw, cin)) ---
    # TODO(synk): in-kernel (kh,kw) tap accumulation over a phase-split input.
    xb = x_nhwc.astype(jnp.bfloat16)
    xp = jnp.pad(xb, ((0, 0), (pad, pad), (pad, pad), (0, 0)))
    cols = []
    for kh in range(K):
        for kw in range(K):
            cols.append(xp[:, kh:kh + stride * (Ho - 1) + 1:stride,
                            kw:kw + stride * (Wo - 1) + 1:stride, :])
    patches = jnp.stack(cols, axis=3).reshape(M, KKC)

    # --- lane-aligned pads + M tiling (>=2 tiles when possible for v7x) ---
    KKC_pad = _round_up(KKC, LANE)
    C_pad = _round_up(Cout, LANE)
    tile_m = min(tile_m_max, _round_up(_cdiv(M, 2), SUBLANE_BF16))
    M_pad = _round_up(M, tile_m)
    num_tiles = M_pad // tile_m

    patches = jnp.pad(patches, ((0, M_pad - M), (0, KKC_pad - KKC)))
    w2 = jnp.pad(w_hwio.reshape(KKC, Cout).astype(jnp.bfloat16),
                 ((0, KKC_pad - KKC), (0, C_pad - Cout)))

    p_spec = pl.BlockSpec((tile_m, KKC_pad), lambda i: (i, 0))
    w_spec = pl.BlockSpec((KKC_pad, C_pad), lambda i: (0, 0))   # resident weight
    o_spec = pl.BlockSpec((tile_m, C_pad), lambda i: (i, 0))

    out_itemsize = jnp.dtype(out_dtype).itemsize
    vmem_est = (2 * tile_m * KKC_pad * 2          # patches, double-buffered bf16
                + 2 * KKC_pad * C_pad * 2         # weight (worst case 2 buffers)
                + 2 * tile_m * C_pad * out_itemsize
                + 4 * KKC_pad * 4 + 4 * C_pad * 4
                + 4 * 2 * C_pad * 4)              # affine / bias / stats (tiny)
    vmem_limit = int(min(64 * 1024 * 1024,
                         max(32 * 1024 * 1024, int(vmem_est * 1.5))))
    cparams = pltpu.CompilerParams(dimension_semantics=("parallel",),
                                   vmem_limit_bytes=vmem_limit)

    inputs = [patches, w2]
    in_specs = [p_spec, w_spec]
    if in_affine is not None:
        scale_c, shift_c = in_affine
        aff = jnp.stack([jnp.tile(scale_c.astype(jnp.float32), K * K),
                         jnp.tile(shift_c.astype(jnp.float32), K * K)], axis=0)
        aff = jnp.pad(aff, ((0, 0), (0, KKC_pad - KKC)))
        inputs.append(aff)
        in_specs.append(pl.BlockSpec((2, KKC_pad), lambda i: (0, 0)))

    kernel = _make_conv_kernel(has_in_affine=in_affine is not None,
                               use_bn=use_bn, activation=activation,
                               tile_m=tile_m, m_total=M)

    if not use_bn:
        b_pad = jnp.pad(b.astype(jnp.float32), (0, C_pad - Cout)).reshape(1, C_pad)
        inputs.append(b_pad)
        in_specs.append(pl.BlockSpec((1, C_pad), lambda i: (0, 0)))
        out = pl.pallas_call(
            kernel,
            out_shape=jax.ShapeDtypeStruct((M_pad, C_pad), out_dtype),
            grid=(num_tiles,),
            in_specs=in_specs,
            out_specs=o_spec,
            compiler_params=cparams,
        )(*inputs)
        return out[:M, :Cout].reshape(N, Ho, Wo, Cout), None

    # BN layer: a single GEMM pass that also emits per-tile channel sums and
    # sums of squares.  Padded rows are masked in-kernel; the conv bias is
    # skipped since it cancels under mean subtraction.
    y, stats = pl.pallas_call(
        kernel,
        out_shape=(jax.ShapeDtypeStruct((M_pad, C_pad), out_dtype),
                   jax.ShapeDtypeStruct((num_tiles, 2, C_pad), jnp.float32)),
        grid=(num_tiles,),
        in_specs=in_specs,
        out_specs=(o_spec, pl.BlockSpec((None, 2, C_pad), lambda i: (i, 0, 0))),
        compiler_params=cparams,
    )(*inputs)

    # Tiny cross-tile reduction + affine folding in JAX.
    # TODO(synk): shifted / Welford variance for very large M (cancellation).
    total = jnp.sum(stats, axis=0)                        # (2, C_pad)
    mean = total[0, :Cout] / M
    var = jnp.maximum(total[1, :Cout] / M - mean * mean, 0.0)
    scale = gamma.astype(jnp.float32) * jax.lax.rsqrt(var + eps)
    shift = beta.astype(jnp.float32) - mean * scale
    return y[:M, :Cout].reshape(N, Ho, Wo, Cout), (scale, shift)


# ----------------------------------------------------------------------------
# Discriminator: parameter init + forward
# ----------------------------------------------------------------------------
def init_discriminator_params(key, ndf, nDep, ncIn=3):
    """Matches PyTorch Conv2d default init (uniform +-1/sqrt(fan_in))."""
    params = []
    of = ncIn
    for i in range(nDep):
        nf = 1 if i == nDep - 1 else ndf * (2 ** i)
        key, kw, kb = jax.random.split(key, 3)
        bound = 1.0 / math.sqrt(of * 5 * 5)
        w = jax.random.uniform(kw, (5, 5, of, nf), jnp.float32, -bound, bound)
        b = jax.random.uniform(kb, (nf,), jnp.float32, -bound, bound)
        gamma = jnp.ones((nf,), jnp.float32)   # BatchNorm2d default weight
        beta = jnp.zeros((nf,), jnp.float32)   # BatchNorm2d default bias
        params.append(dict(w=w, b=b, gamma=gamma, beta=beta))
        of = nf
    return params


def discriminator_forward(x_nchw, params, *, wgan=False, bsigm=True):
    """Pallas implementation of Discriminator.forward(input, opt)."""
    x = jnp.transpose(x_nchw, (0, 2, 3, 1)).astype(jnp.float32)  # NCHW -> NHWC
    nDep = len(params)
    pending = None   # deferred BN (scale, shift) + LeakyReLU for the next layer
    for i, p in enumerate(params):
        last = (i == nDep - 1)
        use_bn = (i != 0) and (not last) and (not wgan)
        if not last:
            act = "leaky"
        elif bsigm:
            act = "sigmoid"
        else:
            act = "none"
        x, pending = conv_layer(
            x, p["w"], p["b"], p["gamma"], p["beta"],
            stride=2, pad=2, use_bn=use_bn, activation=act, in_affine=pending,
            out_dtype=jnp.float32 if last else jnp.bfloat16)
    assert pending is None  # last layer never has BN, so nothing is deferred
    out = jnp.transpose(x, (0, 3, 1, 2))  # NHWC -> NCHW (match PyTorch output)
    if wgan:
        # output.mean(3).mean(2).unsqueeze(2).unsqueeze(3)
        out = jnp.mean(out, axis=(2, 3), keepdims=True)
    return out


# ----------------------------------------------------------------------------
# Pure-JAX reference for verification
# ----------------------------------------------------------------------------
def reference_forward(x_nchw, params, *, wgan=False, bsigm=True):
    x = jnp.transpose(x_nchw, (0, 2, 3, 1)).astype(jnp.float32)
    nDep = len(params)
    for i, p in enumerate(params):
        last = (i == nDep - 1)
        y = jax.lax.conv_general_dilated(
            x, p["w"], window_strides=(2, 2), padding=[(2, 2), (2, 2)],
            dimension_numbers=("NHWC", "HWIO", "NHWC"),
            precision=jax.lax.Precision.HIGHEST)
        y = y + p["b"]
        if (i != 0) and (not last) and (not wgan):
            mean = jnp.mean(y, axis=(0, 1, 2), keepdims=True)
            var = jnp.mean(jnp.square(y - mean), axis=(0, 1, 2), keepdims=True)
            y = (y - mean) * jax.lax.rsqrt(var + 1e-5)
            y = y * p["gamma"] + p["beta"]
        if not last:
            y = jnp.where(y > 0, y, 0.2 * y)
        elif bsigm:
            y = jax.nn.sigmoid(y)
        x = y
    out = jnp.transpose(x, (0, 3, 1, 2))
    if wgan:
        out = jnp.mean(out, axis=(2, 3), keepdims=True)
    return out


if __name__ == "__main__":
    key = jax.random.PRNGKey(0)
    kx, kp = jax.random.split(key)

    # Small config: ndf=8, nDep=3, ncIn=3, input (2, 3, 16, 16)
    N, ncIn, H, W = 2, 3, 16, 16
    ndf, nDep = 8, 3
    wgan, bsigm = False, True

    x = jax.random.normal(kx, (N, ncIn, H, W), jnp.float32)
    params = init_discriminator_params(kp, ndf, nDep, ncIn)

    fwd = jax.jit(lambda xx, pp: discriminator_forward(xx, pp,
                                                       wgan=wgan, bsigm=bsigm))
    out = jax.block_until_ready(fwd(x, params))
    assert out.shape == (N, 1, 2, 2), out.shape  # 16 -> 8 -> 4 -> 2

    ref = jax.block_until_ready(
        reference_forward(x, params, wgan=wgan, bsigm=bsigm))
    # bf16 MXU operands + bf16 intermediate storage (f32 accumulate) vs
    # HIGHEST-precision f32 reference.
    err = float(jnp.max(jnp.abs(out - ref)))
    assert err < 2.5e-2, err

    print("KERNEL_OK")
</pallas_src>

<mosaic_0001>
module attributes {stable_mosaic.version = 11 : i64} {
  func.func @kernel(%arg0: i32, %arg1: memref<64x128xbf16, #tpu.memory_space<vmem>>, %arg2: memref<128x128xbf16, #tpu.memory_space<vmem>>, %arg3: memref<1x128xf32, #tpu.memory_space<vmem>>, %arg4: memref<64x128xbf16, #tpu.memory_space<vmem>>) attributes {dimension_semantics = [#tpu.dimension_semantics<parallel>], iteration_bounds = array<i64: 2>, scalar_prefetch = 0 : i64, scratch_operands = 0 : i64, tpu.core_type = #tpu.core_type<tc>, window_params = [{transform_indices = @transform_0, window_bounds = array<i64: 64, 128>}, {pipeline_mode = #tpu.pipeline_mode<synchronous>, transform_indices = @transform_1, window_bounds = array<i64: 128, 128>}, {pipeline_mode = #tpu.pipeline_mode<synchronous>, transform_indices = @transform_2, window_bounds = array<i64: 1, 128>}, {transform_indices = @transform_3, window_bounds = array<i64: 64, 128>}]} {
    %c0 = arith.constant 0 : index
    %c0_0 = arith.constant 0 : index
    %0 = vector.load %arg1[%c0, %c0_0] : memref<64x128xbf16, #tpu.memory_space<vmem>>, vector<64x128xbf16>
    %c0_1 = arith.constant 0 : index
    %c0_2 = arith.constant 0 : index
    %1 = vector.load %arg2[%c0_1, %c0_2] : memref<128x128xbf16, #tpu.memory_space<vmem>>, vector<128x128xbf16>
    %cst = arith.constant dense<0.000000e+00> : vector<64x128xf32>
    %2 = tpu.matmul %0, %1, %cst {dimension_numbers = #tpu.dot_dimension_numbers<[1], [0], [0], [1], [0, 0, 1, 1], [], []>} : vector<64x128xbf16>, vector<128x128xbf16>, vector<64x128xf32> -> vector<64x128xf32>
    %c0_3 = arith.constant 0 : index
    %c0_4 = arith.constant 0 : index
    %3 = vector.load %arg3[%c0_3, %c0_4] : memref<1x128xf32, #tpu.memory_space<vmem>>, vector<1x128xf32>
    %4 = vector.broadcast %3 : vector<1x128xf32> to vector<64x128xf32>
    %5 = arith.addf %2, %4 : vector<64x128xf32>
    %cst_5 = arith.constant 0.000000e+00 : f32
    %6 = vector.broadcast %cst_5 : f32 to vector<64x128xf32>
    %7 = arith.cmpf ogt, %5, %6 : vector<64x128xf32>
    %cst_6 = arith.constant 2.000000e-01 : f32
    %8 = vector.broadcast %cst_6 : f32 to vector<64x128xf32>
    %9 = arith.mulf %8, %5 : vector<64x128xf32>
    %10 = arith.select %7, %5, %9 : vector<64x128xi1>, vector<64x128xf32>
    %11 = arith.truncf %10 : vector<64x128xf32> to vector<64x128xbf16>
    %c0_7 = arith.constant 0 : index
    %c0_8 = arith.constant 0 : index
    %12 = vector.load %arg4[%c0_7, %c0_8] : memref<64x128xbf16, #tpu.memory_space<vmem>>, vector<64x128xbf16>
    tpu.vector_store %arg4[%c0_7, %c0_8], %11 {strides = array<i32>} : memref<64x128xbf16, #tpu.memory_space<vmem>>, vector<64x128xbf16>,
    return
  }
  func.func @transform_0(%arg0: i32) -> (i32, i32) {
    %c0_i32 = arith.constant 0 : i32
    %c0_i32_0 = arith.constant 0 : i32
    return %arg0, %c0_i32 : i32, i32
  }
  func.func @transform_1(%arg0: i32) -> (i32, i32) {
    %c0_i32 = arith.constant 0 : i32
    %c0_i32_0 = arith.constant 0 : i32
    %c0_i32_1 = arith.constant 0 : i32
    return %c0_i32, %c0_i32_0 : i32, i32
  }
  func.func @transform_2(%arg0: i32) -> (i32, i32) {
    %c0_i32 = arith.constant 0 : i32
    %c0_i32_0 = arith.constant 0 : i32
    %c0_i32_1 = arith.constant 0 : i32
    return %c0_i32, %c0_i32_0 : i32, i32
  }
  func.func @transform_3(%arg0: i32) -> (i32, i32) {
    %c0_i32 = arith.constant 0 : i32
    %c0_i32_0 = arith.constant 0 : i32
    return %arg0, %c0_i32 : i32, i32
  }
}

module attributes {stable_mosaic.version = 11 : i64} {
  func.func @kernel(%arg0: i32, %arg1: memref<16x256xbf16, #tpu.memory_space<vmem>>, %arg2: memref<256x128xbf16, #tpu.memory_space<vmem>>, %arg3: memref<16x128xbf16, #tpu.memory_space<vmem>>, %arg4: memref<1x2x128xf32, #tpu.memory_space<vmem>>) attributes {dimension_semantics = [#tpu.dimension_semantics<parallel>], iteration_bounds = array<i64: 2>, scalar_prefetch = 0 : i64, scratch_operands = 0 : i64, tpu.core_type = #tpu.core_type<tc>, window_params = [{transform_indices = @transform_0, window_bounds = array<i64: 16, 256>}, {pipeline_mode = #tpu.pipeline_mode<synchronous>, transform_indices = @transform_1, window_bounds = array<i64: 256, 128>}, {transform_indices = @transform_2, window_bounds = array<i64: 16, 128>}, {transform_indices = @transform_3, window_bounds = array<i64: 1, 2, 128>}]} {
    %c0 = arith.constant 0 : index
    %c0_0 = arith.constant 0 : index
    %0 = vector.load %arg1[%c0, %c0_0] : memref<16x256xbf16, #tpu.memory_space<vmem>>, vector<16x256xbf16>
    %c0_1 = arith.constant 0 : index
    %c0_2 = arith.constant 0 : index
    %1 = vector.load %arg2[%c0_1, %c0_2] : memref<256x128xbf16, #tpu.memory_space<vmem>>, vector<256x128xbf16>
    %cst = arith.constant dense<0.000000e+00> : vector<16x128xf32>
    %2 = tpu.matmul %0, %1, %cst {dimension_numbers = #tpu.dot_dimension_numbers<[1], [0], [0], [1], [0, 0, 1, 1], [], []>} : vector<16x256xbf16>, vector<256x128xbf16>, vector<16x128xf32> -> vector<16x128xf32>
    %3 = arith.truncf %2 : vector<16x128xf32> to vector<16x128xbf16>
    %c0_3 = arith.constant 0 : index
    %c0_4 = arith.constant 0 : index
    %4 = vector.load %arg3[%c0_3, %c0_4] : memref<16x128xbf16, #tpu.memory_space<vmem>>, vector<16x128xbf16>
    tpu.vector_store %arg3[%c0_3, %c0_4], %3 {strides = array<i32>} : memref<16x128xbf16, #tpu.memory_space<vmem>>, vector<16x128xbf16>,
    %5 = tpu.iota {dimensions = array<i32: 0>} : vector<16x128xi32>
    %c16_i32 = arith.constant 16 : i32
    %6 = arith.muli %arg0, %c16_i32 : i32
    %7 = vector.broadcast %6 : i32 to vector<16x128xi32>
    %8 = arith.addi %5, %7 : vector<16x128xi32>
    %c32_i32 = arith.constant 32 : i32
    %9 = vector.broadcast %c32_i32 : i32 to vector<16x128xi32>
    %10 = arith.cmpi slt, %8, %9 : vector<16x128xi32>
    %cst_5 = arith.constant 0.000000e+00 : f32
    %11 = vector.broadcast %cst_5 : f32 to vector<16x128xf32>
    %12 = arith.select %10, %2, %11 : vector<16x128xi1>, vector<16x128xf32>
    %cst_6 = arith.constant dense<0.000000e+00> : vector<128xf32>
    %13 = vector.multi_reduction <add>, %12, %cst_6 [0] : vector<16x128xf32> to vector<128xf32>
    %14 = vector.shape_cast %13 : vector<128xf32> to vector<1x128xf32>
    %c0_7 = arith.constant 0 : index
    %c0_8 = arith.constant 0 : index
    %c0_9 = arith.constant 0 : index
    %15 = vector.load %arg4[%c0_7, %c0_8, %c0_9] : memref<1x2x128xf32, #tpu.memory_space<vmem>>, vector<1x1x128xf32>
    %16 = vector.shape_cast %15 : vector<1x1x128xf32> to vector<1x128xf32>
    %17 = vector.shape_cast %14 : vector<1x128xf32> to vector<1x1x128xf32>
    tpu.vector_store %arg4[%c0_7, %c0_8, %c0_9], %17 {strides = array<i32>} : memref<1x2x128xf32, #tpu.memory_space<vmem>>, vector<1x1x128xf32>,
    %18 = arith.mulf %12, %12 : vector<16x128xf32>
    %cst_10 = arith.constant dense<0.000000e+00> : vector<128xf32>
    %19 = vector.multi_reduction <add>, %18, %cst_10 [0] : vector<16x128xf32> to vector<128xf32>
    %20 = vector.shape_cast %19 : vector<128xf32> to vector<1x128xf32>
    %c0_11 = arith.constant 0 : index
    %c1 = arith.constant 1 : index
    %c0_12 = arith.constant 0 : index
    %21 = vector.load %arg4[%c0_11, %c1, %c0_12] : memref<1x2x128xf32, #tpu.memory_space<vmem>>, vector<1x1x128xf32>
    %22 = vector.shape_cast %21 : vector<1x1x128xf32> to vector<1x128xf32>
    %23 = vector.shape_cast %20 : vector<1x128xf32> to vector<1x1x128xf32>
    tpu.vector_store %arg4[%c0_11, %c1, %c0_12], %23 {strides = array<i32>} : memref<1x2x128xf32, #tpu.memory_space<vmem>>, vector<1x1x128xf32>,
    return
  }
  func.func @transform_0(%arg0: i32) -> (i32, i32) {
    %c0_i32 = arith.constant 0 : i32
    %c0_i32_0 = arith.constant 0 : i32
    return %arg0, %c0_i32 : i32, i32
  }
  func.func @transform_1(%arg0: i32) -> (i32, i32) {
    %c0_i32 = arith.constant 0 : i32
    %c0_i32_0 = arith.constant 0 : i32
    %c0_i32_1 = arith.constant 0 : i32
    return %c0_i32, %c0_i32_0 : i32, i32
  }
  func.func @transform_2(%arg0: i32) -> (i32, i32) {
    %c0_i32 = arith.constant 0 : i32
    %c0_i32_0 = arith.constant 0 : i32
    return %arg0, %c0_i32 : i32, i32
  }
  func.func @transform_3(%arg0: i32) -> (i32, i32, i32) {
    %c0_i32 = arith.constant 0 : i32
    %c0_i32_0 = arith.constant 0 : i32
    %c0_i32_1 = arith.constant 0 : i32
    return %arg0, %c0_i32, %c0_i32_0 : i32, i32, i32
  }
}

module attributes {stable_mosaic.version = 11 : i64} {
  func.func @kernel(%arg0: i32, %arg1: memref<16x512xbf16, #tpu.memory_space<vmem>>, %arg2: memref<512x128xbf16, #tpu.memory_space<vmem>>, %arg3: memref<2x512xf32, #tpu.memory_space<vmem>>, %arg4: memref<1x128xf32, #tpu.memory_space<vmem>>, %arg5: memref<16x128xf32, #tpu.memory_space<vmem>>) attributes {dimension_semantics = [#tpu.dimension_semantics<parallel>], iteration_bounds = array<i64: 1>, scalar_prefetch = 0 : i64, scratch_operands = 0 : i64, tpu.core_type = #tpu.core_type<tc>, window_params = [{transform_indices = @transform_0, window_bounds = array<i64: 16, 512>}, {pipeline_mode = #tpu.pipeline_mode<synchronous>, transform_indices = @transform_1, window_bounds = array<i64: 512, 128>}, {pipeline_mode = #tpu.pipeline_mode<synchronous>, transform_indices = @transform_2, window_bounds = array<i64: 2, 512>}, {pipeline_mode = #tpu.pipeline_mode<synchronous>, transform_indices = @transform_3, window_bounds = array<i64: 1, 128>}, {transform_indices = @transform_4, window_bounds = array<i64: 16, 128>}]} {
    %c0 = arith.constant 0 : index
    %c0_0 = arith.constant 0 : index
    %0 = vector.load %arg1[%c0, %c0_0] : memref<16x512xbf16, #tpu.memory_space<vmem>>, vector<16x512xbf16>
    %1 = arith.extf %0 : vector<16x512xbf16> to vector<16x512xf32>
    %c0_1 = arith.constant 0 : index
    %c0_2 = arith.constant 0 : index
    %2 = vector.load %arg3[%c0_1, %c0_2] : memref<2x512xf32, #tpu.memory_space<vmem>>, vector<1x512xf32>
    %3 = vector.broadcast %2 : vector<1x512xf32> to vector<16x512xf32>
    %4 = arith.mulf %1, %3 : vector<16x512xf32>
    %c1 = arith.constant 1 : index
    %c0_3 = arith.constant 0 : index
    %5 = vector.load %arg3[%c1, %c0_3] : memref<2x512xf32, #tpu.memory_space<vmem>>, vector<1x512xf32>
    %6 = vector.broadcast %5 : vector<1x512xf32> to vector<16x512xf32>
    %7 = arith.addf %4, %6 : vector<16x512xf32>
    %cst = arith.constant 0.000000e+00 : f32
    %8 = vector.broadcast %cst : f32 to vector<16x512xf32>
    %9 = arith.cmpf ogt, %7, %8 : vector<16x512xf32>
    %cst_4 = arith.constant 2.000000e-01 : f32
    %10 = vector.broadcast %cst_4 : f32 to vector<16x512xf32>
    %11 = arith.mulf %10, %7 : vector<16x512xf32>
    %12 = arith.select %9, %7, %11 : vector<16x512xi1>, vector<16x512xf32>
    %13 = arith.truncf %12 : vector<16x512xf32> to vector<16x512xbf16>
    %c0_5 = arith.constant 0 : index
    %c0_6 = arith.constant 0 : index
    %14 = vector.load %arg2[%c0_5, %c0_6] : memref<512x128xbf16, #tpu.memory_space<vmem>>, vector<512x128xbf16>
    %cst_7 = arith.constant dense<0.000000e+00> : vector<16x128xf32>
    %15 = tpu.matmul %13, %14, %cst_7 {dimension_numbers = #tpu.dot_dimension_numbers<[1], [0], [0], [1], [0, 0, 1, 1], [], []>} : vector<16x512xbf16>, vector<512x128xbf16>, vector<16x128xf32> -> vector<16x128xf32>
    %c0_8 = arith.constant 0 : index
    %c0_9 = arith.constant 0 : index
    %16 = vector.load %arg4[%c0_8, %c0_9] : memref<1x128xf32, #tpu.memory_space<vmem>>, vector<1x128xf32>
    %17 = vector.broadcast %16 : vector<1x128xf32> to vector<16x128xf32>
    %18 = arith.addf %15, %17 : vector<16x128xf32>
    %cst_10 = arith.constant 0.000000e+00 : f32
    %19 = vector.broadcast %cst_10 : f32 to vector<16x128xf32>
    %20 = arith.subf %19, %18 : vector<16x128xf32>
    %21 = math.exp %20 : vector<16x128xf32>
    %cst_11 = arith.constant 1.000000e+00 : f32
    %22 = vector.broadcast %cst_11 : f32 to vector<16x128xf32>
    %23 = arith.addf %22, %21 : vector<16x128xf32>
    %24 = tpu.reciprocal %23 {approx = true} : vector<16x128xf32> -> vector<16x128xf32>
    %c0_12 = arith.constant 0 : index
    %c0_13 = arith.constant 0 : index
    %25 = vector.load %arg5[%c0_12, %c0_13] : memref<16x128xf32, #tpu.memory_space<vmem>>, vector<16x128xf32>
    tpu.vector_store %arg5[%c0_12, %c0_13], %24 {strides = array<i32>} : memref<16x128xf32, #tpu.memory_space<vmem>>, vector<16x128xf32>,
    return
  }
  func.func @transform_0(%arg0: i32) -> (i32, i32) {
    %c0_i32 = arith.constant 0 : i32
    %c0_i32_0 = arith.constant 0 : i32
    return %arg0, %c0_i32 : i32, i32
  }
  func.func @transform_1(%arg0: i32) -> (i32, i32) {
    %c0_i32 = arith.constant 0 : i32
    %c0_i32_0 = arith.constant 0 : i32
    %c0_i32_1 = arith.constant 0 : i32
    return %c0_i32, %c0_i32_0 : i32, i32
  }
  func.func @transform_2(%arg0: i32) -> (i32, i32) {
    %c0_i32 = arith.constant 0 : i32
    %c0_i32_0 = arith.constant 0 : i32
    %c0_i32_1 = arith.constant 0 : i32
    return %c0_i32, %c0_i32_0 : i32, i32
  }
  func.func @transform_3(%arg0: i32) -> (i32, i32) {
    %c0_i32 = arith.constant 0 : i32
    %c0_i32_0 = arith.constant 0 : i32
    %c0_i32_1 = arith.constant 0 : i32
    return %c0_i32, %c0_i32_0 : i32, i32
  }
  func.func @transform_4(%arg0: i32) -> (i32, i32) {
    %c0_i32 = arith.constant 0 : i32
    %c0_i32_0 = arith.constant 0 : i32
    return %arg0, %c0_i32 : i32, i32
  }
}

</mosaic_0001>

<bundles_post_ra>
// kernel: _lambda_.3
= control target key start
LH: loop header
LB: loop body
LE: loop exit
PB: predicated region body
PF: predicated region fallthrough
CT: control target
= control target key end

     0   :  { %s626_s12 = smov 0   ;;  %s683_s0 = inlined_call_operand.vmem [shape: bf16[128,128], index: 0, kind: input, shape index: {}]   ;;  %s684_s1 = inlined_call_operand.vmem [shape: bf16[128,128], index: 1, kind: input, shape index: {}]   ;;  %s685_s2 = inlined_call_operand.vmem [shape: f32[1,128], index: 2, kind: input, shape index: {}]   ;;  %s686_s3 = inlined_call_operand.vmem [shape: bf16[128,128], index: 3, kind: output, shape index: {}]  }
   0x1 LB: > { %s463_s13 = sadd.s32 4294967295, %s604_s12   ;;  %p467_p0 = scmp.ge.s32.totalorder %s604_s12, 1  ;;  %s604_s12 = sphi %s626_s12, %s13_s12  }
   0x2   : > { %p138_p1 = scmp.lt.s32.totalorder %s604_s12, 3 }
   0x4   : > { %p139_p2 = pnand %p467_p0, %p138_p1 }
   0x5   : > { %s468_s16 = sshll.u32 (!%p139_p2), %s463_s13, 3 }
   0x6   : > { %142 = sbr.rel (%p139_p2) target bundleno = 253 (0xfd), region = 32  ;;  %p163_p3 = scmp.lt.s32.totalorder (!%p139_p2), %s468_s16, 15 }
   0xb   : > { %v586_v0 = vld [vmem:[%s684_s1 + $0x38] sm:$0xff]   ;;  %v587_v1 = vld [vmem:[%s684_s1 + $0x30] sm:$0xff]   ;;  %s688_s16 = smov (!%p163_p3, %s468_s16), 15  ;;  %v588_v2 = vld [vmem:[%s684_s1 + $0x28] sm:$0xff]  }
   0xc   : > { %538 = vmatprep.subr.bf16.mxu0 %v586_v0  ;;  %562 = vmatprep.subr.bf16.mxu1 %v586_v0  ;;  %s469_s21 = sshll.u32 %s688_s16, 2  ;;  %v589_v3 = vld [vmem:[%s684_s1 + $0x20] sm:$0xff]   ;;  %v590_v6 = vld [vmem:[%s684_s1 + $0x18] sm:$0xff]   ;;  %v591_v7 = vld [vmem:[%s684_s1 + $0x10] sm:$0xff]  }
   0xd   : > { %539 = vmatpush3.bf16.msra.mxu0 %v586_v0  ;;  %570 = vmatpush3.bf16.msra.mxu1 %v586_v0  ;;  %s651_s24 = scalar_lea.vmem %s683_s0, %s469_s21  ;;  %v592_v8 = vld [vmem:[%s684_s1 + $0x8] sm:$0xff]   ;;  %v593_v9 = vld [vmem:[%s684_s1] sm:$0xff]   ;;  %s172_s13 = scalar_lea.vmem %s686_s3, %s469_s21 }
   0xe   : > { %540 = vmatprep.subr.bf16.mxu0 %v587_v1  ;;  %563 = vmatprep.subr.bf16.mxu1 %v587_v1  ;;  %v594_v4 = vld [vmem:[%s651_s24] sm:$0xff]   ;;  %v595_v5 = vld [vmem:[%s651_s24 + $0x10] sm:$0xff]   ;;  %v596_v10 = vld [vmem:[%s651_s24 + $0x8] sm:$0xff]  }
   0xf   : > { %554 = vmatprep.mubr.bf16.mxu0 %v594_v4  ;;  %558 = vmatprep.mubr.bf16.mxu1 %v595_v5  ;;  %v597_v11 = vld [vmem:[%s651_s24 + $0x18] sm:$0xff]   ;;  %v472_v12 = vld [vmem:[%s685_s2] ss:$0 sm:$0xff] }
  0x11   : > { %541 = vmatpush3.bf16.msra.mxu0 %v587_v1  ;;  %571 = vmatpush3.bf16.msra.mxu1 %v587_v1 }
  0x12   : > { %542 = vmatprep.subr.bf16.mxu0 %v588_v2  ;;  %564 = vmatprep.subr.bf16.mxu1 %v588_v2 }
  0x15   : > { %543 = vmatpush3.bf16.msra.mxu0 %v588_v2  ;;  %572 = vmatpush3.bf16.msra.mxu1 %v588_v2 }
  0x16   : > { %544 = vmatprep.subr.bf16.mxu0 %v589_v3  ;;  %565 = vmatprep.subr.bf16.mxu1 %v589_v3 }
  0x19   : > { %545 = vmatpush3.bf16.msra.mxu0 %v589_v3  ;;  %573 = vmatpush3.bf16.msra.mxu1 %v589_v3 }
  0x1a   : > { %546 = vmatprep.subr.bf16.mxu0 %v590_v6  ;;  %566 = vmatprep.subr.bf16.mxu1 %v590_v6 }
  0x1d   : > { %547 = vmatpush3.bf16.msra.mxu0 %v590_v6  ;;  %574 = vmatpush3.bf16.msra.mxu1 %v590_v6 }
  0x1e   : > { %548 = vmatprep.subr.bf16.mxu0 %v591_v7  ;;  %567 = vmatprep.subr.bf16.mxu1 %v591_v7 }
  0x21   : > { %549 = vmatpush3.bf16.msra.mxu0 %v591_v7  ;;  %575 = vmatpush3.bf16.msra.mxu1 %v591_v7 }
  0x22   : > { %550 = vmatprep.subr.bf16.mxu0 %v592_v8  ;;  %568 = vmatprep.subr.bf16.mxu1 %v592_v8 }
  0x25   : > { %551 = vmatpush3.bf16.msra.mxu0 %v592_v8  ;;  %576 = vmatpush3.bf16.msra.mxu1 %v592_v8 }
  0x26   : > { %552 = vmatprep.subr.bf16.mxu0 %v593_v9  ;;  %569 = vmatprep.subr.bf16.mxu1 %v593_v9 }
  0x29   : > { %553 = vmatpush3.bf16.msra.mxu0 %v593_v9  ;;  %577 = vmatpush3.bf16.msra.mxu1 %v593_v9 }
  0x2c   : > { %555 = vmatmul.mubr.bf16.vlgmr.msra.gmra.mxu0 %v596_v10  ;;  %559 = vmatmul.mubr.bf16.vlgmr.msra.gmra.mxu1 %v597_v11 }
  0xec   : > { %v556_v13 = vpop.f32.mrf.mxu0  ;;  %v560_v14 = vpop.f32.mrf.mxu1 }
  0xed   : > { %v321_v15 = vadd.f32 %v556_v13, %v472_v12  ;;  %v337_v16 = vadd.f32 %v560_v14, %v472_v12 }
  0xee   : > { %v312_v17 = vpop.f32.mrf.mxu0  ;;  %v328_v18 = vpop.f32.mrf.mxu1 }
  0xef   : > { %vm345_vm0 = vcmp.gt.f32.partialorder %v321_v15, 0.0  ;;  %v353_v19 = vmul.f32 0.2, %v321_v15  ;;  %vm349_vm1 = vcmp.gt.f32.partialorder %v337_v16, 0.0  ;;  %v357_v20 = vmul.f32 0.2, %v337_v16 }
  0xf0   : > { %v313_v21 = vadd.f32 %v472_v12, %v312_v17  ;;  %v557_v22 = vpop.f32.mrf.mxu0  ;;  %v561_v23 = vpop.f32.mrf.mxu1  ;;  %v329_v24 = vadd.f32 %v472_v12, %v328_v18 }
  0xf1   : > { %v324_v25 = vadd.f32 %v557_v22, %v472_v12  ;;  %v340_v26 = vadd.f32 %v561_v23, %v472_v12  ;;  %v361_v27 = vsel %vm345_vm0, %v321_v15, %v353_v19  ;;  %v365_v28 = vsel %vm349_vm1, %v337_v16, %v357_v20 }
  0xf2   : > { %v315_v29 = vpop.f32.mrf.mxu0  ;;  %v331_v30 = vpop.f32.mrf.mxu1  ;;  %vm343_vm4 = vcmp.gt.f32.partialorder %v313_v21, 0.0  ;;  %v351_v33 = vmul.f32 0.2, %v313_v21  ;;  %vm347_vm5 = vcmp.gt.f32.partialorder %v329_v24, 0.0  ;;  %v355_v36 = vmul.f32 0.2, %v329_v24 }
  0xf3   : > { %vm346_vm2 = vcmp.gt.f32.partialorder %v324_v25, 0.0  ;;  %v354_v31 = vmul.f32 0.2, %v324_v25  ;;  %vm350_vm3 = vcmp.gt.f32.partialorder %v340_v26, 0.0  ;;  %v358_v32 = vmul.f32 0.2, %v340_v26 }
  0xf4   : > { %v316_v34 = vadd.f32 %v472_v12, %v315_v29  ;;  %v332_v35 = vadd.f32 %v472_v12, %v331_v30  ;;  %v359_v43 = vsel %vm343_vm4, %v313_v21, %v351_v33  ;;  %v363_v45 = vsel %vm347_vm5, %v329_v24, %v355_v36 }
  0xf5   : > { %v362_v37 = vsel %vm346_vm2, %v324_v25, %v354_v31  ;;  %v366_v38 = vsel %vm350_vm3, %v340_v26, %v358_v32 }
  0xf6   : > { %v511_v39 = vpack.c.bf16 %v362_v37, %v361_v27  ;;  %v521_v40 = vpack.c.bf16 %v366_v38, %v365_v28  ;;  %vm344_vm6 = vcmp.gt.f32.partialorder %v316_v34, 0.0  ;;  %v352_v41 = vmul.f32 0.2, %v316_v34 }
  0xf7   : > { %vm348_vm7 = vcmp.gt.f32.partialorder %v332_v35, 0.0  ;;  %v356_v42 = vmul.f32 0.2, %v332_v35 }
  0xf8   : > { %523 = vst [vmem:[%s172_s13 + $0x8] sm:$0xff] %v511_v39   ;;  %525 = vst [vmem:[%s172_s13 + $0x18] sm:$0xff] %v521_v40   ;;  %v360_v44 = vsel %vm344_vm6, %v316_v34, %v352_v41 }
  0xf9   : > { %v506_v46 = vpack.c.bf16 %v360_v44, %v359_v43  ;;  %v364_v47 = vsel %vm348_vm7, %v332_v35, %v356_v42 }
  0xfa   : > { %v516_v48 = vpack.c.bf16 %v364_v47, %v363_v45 }
  0xfb   : > { %507 = vst [vmem:[%s172_s13] sm:$0xff] %v506_v46  }
  0xfc   : > { %524 = vst [vmem:[%s172_s13 + $0x10] sm:$0xff] %v516_v48  }
  0xfd PF: > { %s13_s12 = sadd.s32 1, %s604_s12  }
  0xfe   : > { %p10_p4 = scmp.ge.s32.totalorder %s13_s12, 4  }
 0x100   :  { %12 = sbr.rel (!%p10_p4) target bundleno = 1 (0x1), region = 62 }

// kernel: tile.13
= control target key start
LH: loop header
LB: loop body
LE: loop exit
PB: predicated region body
PF: predicated region fallthrough
CT: control target
= control target key end

     0   :  { %s40_s0 = inlined_call_operand.vmem [shape: f32[16], index: 0, kind: input, shape index: {}]   ;;  %s41_s1 = inlined_call_operand.vmem [shape: f32[25,16], index: 1, kind: output, shape index: {}]  }
   0x1   :  { %v4_v0 = vld [vmem:[%s40_s0] ss:$0 sm:$0xff] }
   0x2   :  { %5 = vst [vmem:[%s41_s1] sm:$0xff] %v4_v0  ;;  %12 = vst [vmem:[%s41_s1 + $0x8] sm:$0xff] %v4_v0 }
   0x3   :  { %13 = vst [vmem:[%s41_s1 + $0x10] sm:$0xff] %v4_v0  ;;  %14 = vst [vmem:[%s41_s1 + $0x18] sm:$0xff] %v4_v0 }

// kernel: tile.18
= control target key start
LH: loop header
LB: loop body
LE: loop exit
PB: predicated region body
PF: predicated region fallthrough
CT: control target
= control target key end

     0   :  { %s94_s8 = smov 112   ;;  %s95_s11 = smov 80   ;;  %vm3_vm0 = vcmask 130048   ;;  %vm9_vm1 = vcmask 1048448   ;;  %vm15_vm2 = vcmask 917248   ;;  %vm21_vm3 = vcmask 786048   ;;  %s147_s0 = inlined_call_operand.vmem [shape: f32[25,16], index: 0, kind: input, shape index: {}]   ;;  %s148_s1 = inlined_call_operand.vmem [shape: f32[1,400], index: 1, kind: output, shape index: {}]  }
   0x1   :  { %v77_v0 = vld [vmem:[%s147_s0 + $0x7] ss:$8 sm:$0x7]   ;;  %v79_v1 = vld [vmem:[%s147_s0 + $0x5] ss:$8 sm:$0x7]  }
   0x2   :  { %7 = vrot.lane.b32.xlu0 %v77_v0, %s94_s8  ;;  %19 = vrot.lane.b32.xlu1 %v79_v1, %s95_s11  ;;  %v78_v2 = vld [vmem:[%s147_s0 + $0x6] ss:$8 sm:$0x7]   ;;  %v80_v3 = vld [vmem:[%s147_s0 + $0x4] ss:$8 sm:$0x7]  }
   0x3   :  { %s96_s16 = smov 96   ;;  %v2_v4 = vld [vmem:[%s147_s0] ss:$8 sm:$0xf]   ;;  %s97_s19 = smov 64   ;;  %vm27_vm4 = vcmask 654848  }
   0x4   :  { %v81_v5 = vld [vmem:[%s147_s0 + $0x3] ss:$8 sm:$0x7]   ;;  %4 = vst.msk [vmem:[#allocation0] ss:$8 sm:$0xf] %vm3_vm0, %v2_v4  }
   0x5   :  { %v82_v6 = vld [vmem:[%s147_s0 + $0x2] ss:$8 sm:$0x7]   ;;  %s98_s24 = smov 48   ;;  %s99_s25 = smov 32   ;;  %vm33_vm5 = vcmask 523648  }
   0x6   :  { %13 = vrot.lane.b32.xlu0 %v78_v2, %s96_s16  ;;  %25 = vrot.lane.b32.xlu1 %v80_v3, %s97_s19  ;;  %v83_v7 = vld [vmem:[%s147_s0 + $0x1] ss:$8 sm:$0x7]   ;;  %s100_s0 = smov 16   ;;  %vm39_vm6 = vcmask 392448   ;;  %vm45_vm7 = vcmask 261248  }
   0xa   :  { %31 = vrot.lane.b32.xlu0 %v81_v5, %s98_s24  ;;  %37 = vrot.lane.b32.xlu1 %v82_v6, %s99_s25 }
   0xb   :  { %v69_v8 = vld [vmem:[#allocation0 + $0x18] sm:$0x1] }
   0xc   :  { %86 = vst [vmem:[%s148_s1 + $0x3] sm:$0x1] %v69_v8 }
   0xe   :  { %43 = vrot.lane.b32.xlu0 %v83_v7, %s100_s0 }
  0x74   :  { %v8_v9 = vpop.permute.xlu0 %7   ;;  %v20_v10 = vpop.permute.xlu1 %19  }
  0x75   :  { %10 = vst.msk [vmem:[#allocation0] ss:$8 sm:$0x7] %vm9_vm1, %v8_v9  }
  0x78   :  { %v14_v11 = vpop.permute.xlu0 %13   ;;  %v26_v12 = vpop.permute.xlu1 %25  }
  0x79   :  { %16 = vst.msk [vmem:[#allocation0] ss:$8 sm:$0x7] %vm15_vm2, %v14_v11  }
  0x7a   :  { %22 = vst.msk [vmem:[#allocation0] ss:$8 sm:$0x7] %vm21_vm3, %v20_v10  }
  0x7b   :  { %28 = vst.msk [vmem:[#allocation0] ss:$8 sm:$0x7] %vm27_vm4, %v26_v12  }
  0x7c   :  { %v32_v13 = vpop.permute.xlu0 %31   ;;  %v38_v14 = vpop.permute.xlu1 %37  }
  0x7d   :  { %34 = vst.msk [vmem:[#allocation0] ss:$8 sm:$0x7] %vm33_vm5, %v32_v13  }
  0x7e   :  { %40 = vst.msk [vmem:[#allocation0] ss:$8 sm:$0x7] %vm39_vm6, %v38_v14  }
  0x80   :  { %v44_v15 = vpop.permute.xlu0 %43  }
  0x81   :  { %46 = vst.msk [vmem:[#allocation0] ss:$8 sm:$0x7] %vm45_vm7, %v44_v15  }
  0x88   :  { %v51_v16 = vld [vmem:[#allocation0] sm:$0x1]  ;;  %v56_v17 = vld [vmem:[#allocation0 + $0x8] sm:$0x1]  ;;  %v62_v18 = vld [vmem:[#allocation0 + $0x10] sm:$0x1] }
  0x89   :  { %54 = vst [vmem:[%s148_s1] sm:$0x1] %v51_v16  ;;  %84 = vst [vmem:[%s148_s1 + $0x1] sm:$0x1] %v56_v17 }
  0x8a   :  { %85 = vst [vmem:[%s148_s1 + $0x2] sm:$0x1] %v62_v18 }

// kernel: _lambda_.4
= control target key start
LH: loop header
LB: loop body
LE: loop exit
PB: predicated region body
PF: predicated region fallthrough
CT: control target
= control target key end

     0   :  { %s615_s12 = smov 0   ;;  %s693_s0 = inlined_call_operand.vmem [shape: bf16[32,256], index: 0, kind: input, shape index: {}]   ;;  %s694_s1 = inlined_call_operand.vmem [shape: bf16[256,128], index: 1, kind: input, shape index: {}]   ;;  %s695_s2 = inlined_call_operand.vmem [shape: bf16[32,128], index: 2, kind: output, shape index: {0}]   ;;  %s696_s3 = inlined_call_operand.vmem [shape: f32[2,2,128], index: 3, kind: output, shape index: {1}]  }
   0x1 LB: > { %s621_s13 = sadd.s32 4294967295, %s593_s12   ;;  %p500_p0 = scmp.ge.s32.totalorder %s593_s12, 1  ;;  %s593_s12 = sphi %s615_s12, %s14_s12  }
   0x2   : > { %p142_p1 = scmp.lt.s32.totalorder %s593_s12, 3 }
   0x4   : > { %p143_p2 = pnand %p500_p0, %p142_p1 }
   0x5   : > { %s501_s16 = sshll.u32 (!%p143_p2), %s621_s13, 1  ;;  %s527_s27 = sshll.u32 (!%p143_p2), %s621_s13, 4 }
   0x6   : > { %146 = sbr.rel (%p143_p2) target bundleno = 263 (0x107), region = 28  ;;  %p172_p3 = scmp.lt.s32.totalorder (!%p143_p2), %s501_s16, 3 }
   0x7   : > { %p184_p4 = scmp.lt.s32.totalorder (!%p143_p2), %s621_s13, 1 }
   0xb   : > { %v568_v0 = vld [vmem:[%s694_s1 + $0x78] sm:$0xff]   ;;  %v570_v2 = vld [vmem:[%s694_s1 + $0x70] sm:$0xff]   ;;  %v572_v4 = vld [vmem:[%s694_s1 + $0x68] sm:$0xff]   ;;  %s698_s16 = smov (!%p172_p3, %s501_s16), 3  ;;  %v380_v18 = vlaneseq  ;;  %v384_v20 = vstv %s527_s27  ;;  %s700_s13 = smov (!%p184_p4, %s621_s13), 1 }
   0xc   : > { %v569_v1 = vld [vmem:[%s694_s1 + $0x38] sm:$0xff]   ;;  %538 = vmatprep.subr.bf16.mxu0 %v568_v0  ;;  %v571_v3 = vld [vmem:[%s694_s1 + $0x30] sm:$0xff]   ;;  %v573_v5 = vld [vmem:[%s694_s1 + $0x28] sm:$0xff]   ;;  %s530_s4 = sshll.u32 %s698_s16, 3  ;;  %s505_s28 = sshll.u32 %s698_s16, 2 }
   0xd   : > { %539 = vmatpush3.bf16.msra.mxu0 %v569_v1  ;;  %v574_v6 = vld [vmem:[%s694_s1 + $0x60] sm:$0xff]   ;;  %v576_v8 = vld [vmem:[%s694_s1 + $0x58] sm:$0xff]   ;;  %s176_s9 = scalar_lea.vmem %s693_s0, %s530_s4  ;;  %v578_v10 = vld [vmem:[%s694_s1 + $0x50] sm:$0xff]   ;;  %v381_v19 = vshrl.u32 %v380_v18, 7  ;;  %s182_s4 = scalar_lea.vmem %s695_s2, %s505_s28 }
   0xe   : > { %540 = vmatprep.subr.bf16.mxu0 %v570_v2  ;;  %v575_v7 = vld [vmem:[%s694_s1 + $0x20] sm:$0xff]   ;;  %v577_v9 = vld [vmem:[%s694_s1 + $0x18] sm:$0xff]   ;;  %v579_v12 = vld [vmem:[%s694_s1 + $0x10] sm:$0xff]   ;;  %s506_s16 = sshll.u32 %s700_s13, 1 }
   0xf   : > { %v586_v11 = vld [vmem:[%s176_s9 + $0x4] ss:$8 sps:$4 sm:$0xff]   ;;  %v584_v17 = vld [vmem:[%s176_s9] ss:$8 sps:$4 sm:$0xff]   ;;  %v382_v21 = vadd.s32 8, %v381_v19  ;;  %v385_v23 = vadd.s32 %v384_v20, %v381_v19  ;;  %s187_s7 = scalar_lea.vmem %s696_s3, %s506_s16 }
  0x10   : > { %361 = vmatprep.mubr.bf16.mxu0 %v586_v11  ;;  %v580_v13 = vld [vmem:[%s694_s1 + $0x48] sm:$0xff]   ;;  %v582_v15 = vld [vmem:[%s694_s1 + $0x40] sm:$0xff]  }
  0x11   : > { %541 = vmatpush3.bf16.msra.mxu0 %v571_v3  ;;  %v581_v14 = vld [vmem:[%s694_s1 + $0x8] sm:$0xff]   ;;  %v583_v16 = vld [vmem:[%s694_s1] sm:$0xff]   ;;  %v386_v25 = vadd.s32 %v384_v20, %v382_v21  ;;  %vm387_vm0 = vcmp.lt.s32.totalorder %v385_v23, 32 }
  0x12   : > { %542 = vmatprep.subr.bf16.mxu0 %v572_v4 }
  0x13   : > { %vm388_vm1 = vcmp.lt.s32.totalorder %v386_v25, 32 }
  0x15   : > { %543 = vmatpush3.bf16.msra.mxu0 %v573_v5 }
  0x16   : > { %544 = vmatprep.subr.bf16.mxu0 %v574_v6 }
  0x19   : > { %545 = vmatpush3.bf16.msra.mxu0 %v575_v7 }
  0x1a   : > { %546 = vmatprep.subr.bf16.mxu0 %v576_v8 }
  0x1d   : > { %547 = vmatpush3.bf16.msra.mxu0 %v577_v9 }
  0x1e   : > { %548 = vmatprep.subr.bf16.mxu0 %v578_v10 }
  0x21   : > { %549 = vmatpush3.bf16.msra.mxu0 %v579_v12 }
  0x22   : > { %550 = vmatprep.subr.bf16.mxu0 %v580_v13 }
  0x25   : > { %551 = vmatpush3.bf16.msra.mxu0 %v581_v14 }
  0x26   : > { %552 = vmatprep.subr.bf16.mxu0 %v582_v15 }
  0x29   : > { %553 = vmatpush3.bf16.msra.mxu0 %v583_v16 }
  0x2c   : > { %362 = vmatmul.mubr.bf16.vlgmr.msra.gmra.mxu0 %v584_v17 }
  0xec   : > { %v554_v22 = vpop.f32.mrf.mxu0 }
  0xee   : > { %v555_v24 = vpop.f32.mrf.mxu0 }
  0xef   : > { %v556_v26 = vadd.f32 %v555_v24, %v554_v22 }
  0xf0   : > { %v557_v27 = vpop.f32.mrf.mxu0 }
  0xf1   : > { %v389_v29 = vsel %vm387_vm0, %v556_v26, 0.0 }
  0xf2   : > { %v558_v28 = vpop.f32.mrf.mxu0  ;;  %v399_v33 = vmul.f32 %v389_v29, %v389_v29 }
  0xf3   : > { %v559_v30 = vadd.f32 %v558_v28, %v557_v27 }
  0xf5   : > { %v536_v31 = vpack.c.bf16 %v559_v30, %v556_v26  ;;  %v390_v32 = vsel %vm388_vm1, %v559_v30, 0.0 }
  0xf6   : > { %v391_v34 = vadd.f32 %v390_v32, %v389_v29  ;;  %v400_v35 = vmul.f32 %v390_v32, %v390_v32 }
  0xf7   : > { %537 = vst [vmem:[%s182_s4] sm:$0xff] %v536_v31  }
  0xf8   : > { %v392_v36 = vrot.slane %v391_v34, 4  ;;  %v401_v37 = vadd.f32 %v400_v35, %v399_v33 }
  0xfa   : > { %v393_v38 = vadd.f32 %v392_v36, %v391_v34  ;;  %v402_v39 = vrot.slane %v401_v37, 4 }
  0xfc   : > { %v394_v40 = vrot.slane %v393_v38, 2  ;;  %v403_v41 = vadd.f32 %v402_v39, %v401_v37 }
  0xfe   : > { %v395_v42 = vadd.f32 %v394_v40, %v393_v38  ;;  %v404_v43 = vrot.slane %v403_v41, 2 }
 0x100   : > { %v396_v44 = vrot.slane %v395_v42, 1  ;;  %v405_v45 = vadd.f32 %v404_v43, %v403_v41 }
 0x102   : > { %v397_v46 = vadd.f32 %v396_v44, %v395_v42  ;;  %v406_v47 = vrot.slane %v405_v45, 1 }
 0x104   : > { %398 = vst [vmem:[%s187_s7] sm:$0x1] %v397_v46  ;;  %v407_v48 = vadd.f32 %v406_v47, %v405_v45 }
 0x106   : > { %408 = vst [vmem:[%s187_s7 + $0x1] sm:$0x1] %v407_v48 }
 0x107 PF: > { %s14_s12 = sadd.s32 1, %s593_s12  }
 0x108   : > { %p11_p5 = scmp.ge.s32.totalorder %s14_s12, 4  }
 0x10a   :  { %13 = sbr.rel (!%p11_p5) target bundleno = 1 (0x1), region = 70 }

// kernel: _lambda_.5
= control target key start
LH: loop header
LB: loop body
LE: loop exit
PB: predicated region body
PF: predicated region fallthrough
CT: control target
= control target key end

     0   :  { %v32_v22 = vlaneseq  ;;  %s746_s1 = inlined_call_operand.vmem [shape: bf16[512,128], index: 1, kind: input, shape index: {}]   ;;  %s747_s0 = inlined_call_operand.vmem [shape: bf16[16,512], index: 0, kind: input, shape index: {}]   ;;  %s748_s2 = inlined_call_operand.vmem [shape: f32[2,512], index: 2, kind: input, shape index: {}]   ;;  %s749_s3 = inlined_call_operand.vmem [shape: f32[1,128], index: 3, kind: input, shape index: {}]   ;;  %s750_s4 = inlined_call_operand.vmem [shape: f32[16,128], index: 4, kind: output, shape index: {}]  }
   0x1   :  { %v558_v0 = vld [vmem:[%s746_s1 + $0x78] sm:$0xff]   ;;  %v562_v4 = vld [vmem:[%s746_s1 + $0x70] sm:$0xff]   ;;  %v566_v8 = vld [vmem:[%s746_s1 + $0x68] sm:$0xff]  }
   0x2   :  { %v559_v1 = vld [vmem:[%s746_s1 + $0xf8] sm:$0xff]   ;;  %514 = vmatprep.subr.bf16.mxu0 %v558_v0  ;;  %v563_v5 = vld [vmem:[%s746_s1 + $0xf0] sm:$0xff]   ;;  %v567_v9 = vld [vmem:[%s746_s1 + $0xe8] sm:$0xff]   ;;  %v33_v27 = vshrl.u32 %v32_v22, 7 }
   0x3   :  { %v560_v2 = vld [vmem:[%s746_s1 + $0x38] sm:$0xff]   ;;  %536 = vmatprep.subr.bf16.mxu1 %v559_v1  ;;  %v564_v6 = vld [vmem:[%s746_s1 + $0x30] sm:$0xff]   ;;  %v568_v10 = vld [vmem:[%s746_s1 + $0x28] sm:$0xff]  }
   0x4   :  { %v561_v3 = vld [vmem:[%s746_s1 + $0xb8] sm:$0xff]   ;;  %515 = vmatpush3.bf16.msra.mxu0 %v560_v2  ;;  %v565_v7 = vld [vmem:[%s746_s1 + $0xb0] sm:$0xff]   ;;  %v569_v11 = vld [vmem:[%s746_s1 + $0xa8] sm:$0xff]   ;;  %v38_v32 = vsub.s32 1, %v33_v27  ;;  %v46_v34 = vsub.s32 3, %v33_v27  ;;  %v34_v36 = vsub.s32 0, %v33_v27 }
   0x5   :  { %537 = vmatpush3.bf16.msra.mxu1 %v561_v3  ;;  %516 = vmatprep.subr.bf16.mxu0 %v562_v4  ;;  %v570_v12 = vld [vmem:[%s746_s1 + $0x60] sm:$0xff]   ;;  %v574_v16 = vld [vmem:[%s746_s1 + $0x58] sm:$0xff]   ;;  %v578_v20 = vld [vmem:[%s746_s1 + $0x50] sm:$0xff]   ;;  %v42_v40 = vsub.s32 2, %v33_v27 }
   0x6   :  { %538 = vmatprep.subr.bf16.mxu1 %v563_v5  ;;  %v571_v13 = vld [vmem:[%s746_s1 + $0xe0] sm:$0xff]   ;;  %v575_v17 = vld [vmem:[%s746_s1 + $0xd8] sm:$0xff]   ;;  %v579_v21 = vld [vmem:[%s746_s1 + $0xd0] sm:$0xff]  }
   0x7   :  { %v572_v14 = vld [vmem:[%s746_s1 + $0x20] sm:$0xff]   ;;  %v576_v18 = vld [vmem:[%s746_s1 + $0x18] sm:$0xff]   ;;  %v580_v23 = vld [vmem:[%s746_s1 + $0x10] sm:$0xff]  }
   0x8   :  { %517 = vmatpush3.bf16.msra.mxu0 %v564_v6  ;;  %v573_v15 = vld [vmem:[%s746_s1 + $0xa0] sm:$0xff]   ;;  %v577_v19 = vld [vmem:[%s746_s1 + $0x98] sm:$0xff]   ;;  %v581_v24 = vld [vmem:[%s746_s1 + $0x90] sm:$0xff]  }
   0x9   :  { %539 = vmatpush3.bf16.msra.mxu1 %v565_v7  ;;  %518 = vmatprep.subr.bf16.mxu0 %v566_v8  ;;  %v582_v25 = vld [vmem:[%s746_s1 + $0x48] sm:$0xff]   ;;  %v586_v30 = vld [vmem:[%s746_s1 + $0x40] sm:$0xff]   ;;  %v20_v38 = vld [vmem:[%s747_s0 + $0x10] sm:$0xff] }
   0xa   :  { %540 = vmatprep.subr.bf16.mxu1 %v567_v9  ;;  %v583_v26 = vld [vmem:[%s746_s1 + $0xc8] sm:$0xff]   ;;  %v587_v31 = vld [vmem:[%s746_s1 + $0xc0] sm:$0xff]   ;;  %v26_v43 = vunpack.c.l.bf16 %v20_v38  ;;  %v27_v44 = vunpack.c.h.bf16 %v20_v38  ;;  %v21_v47 = vld [vmem:[%s747_s0 + $0x18] sm:$0xff] }
   0xb   :  { %v584_v28 = vld [vmem:[%s746_s1 + $0x8] sm:$0xff]   ;;  %v588_v33 = vld [vmem:[%s746_s1] sm:$0xff]   ;;  %v28_v52 = vunpack.c.l.bf16 %v21_v47  ;;  %v29_v53 = vunpack.c.h.bf16 %v21_v47 }
   0xc   :  { %519 = vmatpush3.bf16.msra.mxu0 %v568_v10  ;;  %v585_v29 = vld [vmem:[%s746_s1 + $0x88] sm:$0xff]   ;;  %v589_v35 = vld [vmem:[%s746_s1 + $0x80] sm:$0xff]  }
   0xd   :  { %541 = vmatpush3.bf16.msra.mxu1 %v569_v11  ;;  %520 = vmatprep.subr.bf16.mxu0 %v570_v12  ;;  %v18_v37 = vld [vmem:[%s747_s0] sm:$0xff]  ;;  %v19_v46 = vld [vmem:[%s747_s0 + $0x8] sm:$0xff] }
   0xe   :  { %542 = vmatprep.subr.bf16.mxu1 %v571_v13  ;;  %v30_v39 = vld [vmem:[%s748_s2] ss:$2 sm:$0xf]  ;;  %v22_v41 = vunpack.c.l.bf16 %v18_v37  ;;  %v23_v42 = vunpack.c.h.bf16 %v18_v37  ;;  %v480_v45 = vld [vmem:[%s748_s2 + $0x1] ss:$2 sm:$0xf]  ;;  %v24_v50 = vunpack.c.l.bf16 %v19_v46  ;;  %v25_v51 = vunpack.c.h.bf16 %v19_v46 }
   0xf   :  { %v39_v48 = vrot.slane %v30_v39, %v38_v32  ;;  %v70_v49 = vrot.slane %v480_v45, %v38_v32  ;;  %v47_v54 = vrot.slane %v30_v39, %v46_v34  ;;  %v78_v55 = vrot.slane %v480_v45, %v46_v34  ;;  %v481_v34 = vld [vmem:[%s749_s3] ss:$0 sm:$0xff] }
  0x10   :  { %521 = vmatpush3.bf16.msra.mxu0 %v572_v14  ;;  %v35_v58 = vrot.slane %v30_v39, %v34_v36  ;;  %v66_v59 = vrot.slane %v480_v45, %v34_v36  ;;  %v43_v62 = vrot.slane %v30_v39, %v42_v40  ;;  %v74_v63 = vrot.slane %v480_v45, %v42_v40 }
  0x11   :  { %543 = vmatpush3.bf16.msra.mxu1 %v573_v15  ;;  %522 = vmatprep.subr.bf16.mxu0 %v574_v16  ;;  %v53_v56 = vmul.f32 %v39_v48, %v23_v42  ;;  %v57_v57 = vmul.f32 %v39_v48, %v27_v44  ;;  %v55_v60 = vmul.f32 %v47_v54, %v25_v51 }
  0x12   :  { %544 = vmatprep.subr.bf16.mxu1 %v575_v17  ;;  %v59_v61 = vmul.f32 %v47_v54, %v29_v53  ;;  %v52_v2 = vmul.f32 %v35_v58, %v22_v41  ;;  %v56_v3 = vmul.f32 %v35_v58, %v26_v43  ;;  %v54_v6 = vmul.f32 %v43_v62, %v24_v50 }
  0x13   :  { %v84_v0 = vadd.f32 %v70_v49, %v53_v56  ;;  %v88_v1 = vadd.f32 %v70_v49, %v57_v57  ;;  %v86_v4 = vadd.f32 %v78_v55, %v55_v60  ;;  %v58_v7 = vmul.f32 %v43_v62, %v28_v52 }
  0x14   :  { %523 = vmatpush3.bf16.msra.mxu0 %v576_v18  ;;  %v90_v5 = vadd.f32 %v78_v55, %v59_v61  ;;  %v83_v14 = vadd.f32 %v66_v59, %v52_v2  ;;  %v87_v15 = vadd.f32 %v66_v59, %v56_v3 }
  0x15   :  { %545 = vmatpush3.bf16.msra.mxu1 %v577_v19  ;;  %524 = vmatprep.subr.bf16.mxu0 %v578_v20  ;;  %vm92_vm0 = vcmp.gt.f32.partialorder %v84_v0, 0.0  ;;  %vm96_vm1 = vcmp.gt.f32.partialorder %v88_v1, 0.0  ;;  %v100_v8 = vmul.f32 0.2, %v84_v0  ;;  %v104_v9 = vmul.f32 0.2, %v88_v1 }
  0x16   :  { %546 = vmatprep.subr.bf16.mxu1 %v579_v21  ;;  %vm94_vm2 = vcmp.gt.f32.partialorder %v86_v4, 0.0  ;;  %vm98_vm3 = vcmp.gt.f32.partialorder %v90_v5, 0.0  ;;  %v102_v10 = vmul.f32 0.2, %v86_v4  ;;  %v106_v11 = vmul.f32 0.2, %v90_v5 }
  0x17   :  { %v108_v12 = vsel %vm92_vm0, %v84_v0, %v100_v8  ;;  %v112_v13 = vsel %vm96_vm1, %v88_v1, %v104_v9  ;;  %v85_v19 = vadd.f32 %v74_v63, %v54_v6  ;;  %vm91_vm4 = vcmp.gt.f32.partialorder %v83_v14, 0.0 }
  0x18   :  { %525 = vmatpush3.bf16.msra.mxu0 %v580_v23  ;;  %v116_v16 = vpack.c.bf16 %v112_v13, %v108_v12  ;;  %v110_v17 = vsel %vm94_vm2, %v86_v4, %v102_v10  ;;  %v114_v18 = vsel %vm98_vm3, %v90_v5, %v106_v11  ;;  %vm95_vm5 = vcmp.gt.f32.partialorder %v87_v15, 0.0 }
  0x19   :  { %547 = vmatpush3.bf16.msra.mxu1 %v581_v24  ;;  %526 = vmatprep.subr.bf16.mxu0 %v582_v25  ;;  %v118_v20 = vpack.c.bf16 %v114_v18, %v110_v17  ;;  %v99_v21 = vmul.f32 0.2, %v83_v14  ;;  %v103_v22 = vmul.f32 0.2, %v87_v15  ;;  %v89_v23 = vadd.f32 %v74_v63, %v58_v7 }
  0x1a   :  { %548 = vmatprep.subr.bf16.mxu1 %v583_v26  ;;  %414 = vmatprep.mubr.bf16.mxu0 %v116_v16  ;;  %vm93_vm6 = vcmp.gt.f32.partialorder %v85_v19, 0.0  ;;  %v101_v24 = vmul.f32 0.2, %v85_v19 }
  0x1b   :  { %455 = vmatprep.mubr.bf16.mxu1 %v118_v20  ;;  %v107_v25 = vsel %vm91_vm4, %v83_v14, %v99_v21  ;;  %v111_v26 = vsel %vm95_vm5, %v87_v15, %v103_v22  ;;  %vm97_vm7 = vcmp.gt.f32.partialorder %v89_v23, 0.0  ;;  %v105_v27 = vmul.f32 0.2, %v89_v23 }
  0x1c   :  { %527 = vmatpush3.bf16.msra.mxu0 %v584_v28  ;;  %v109_v28 = vsel %vm93_vm6, %v85_v19, %v101_v24 }
  0x1d   :  { %549 = vmatpush3.bf16.msra.mxu1 %v585_v29  ;;  %528 = vmatprep.subr.bf16.mxu0 %v586_v30  ;;  %v115_v29 = vpack.c.bf16 %v111_v26, %v107_v25  ;;  %v113_v30 = vsel %vm97_vm7, %v89_v23, %v105_v27 }
  0x1e   :  { %550 = vmatprep.subr.bf16.mxu1 %v587_v31  ;;  %v117_v31 = vpack.c.bf16 %v113_v30, %v109_v28 }
  0x20   :  { %529 = vmatpush3.bf16.msra.mxu0 %v588_v33 }
  0x21   :  { %551 = vmatpush3.bf16.msra.mxu1 %v589_v35 }
  0x23   :  { %415 = vmatmul.mubr.bf16.vlgmr.msra.gmra.mxu0 %v115_v29 }
  0x24   :  { %456 = vmatmul.mubr.bf16.vlgmr.msra.gmra.mxu1 %v117_v31 }
  0xe3   :  { %v530_v32 = vpop.f32.mrf.mxu0 }
  0xe4   :  { %v552_v33 = vpop.f32.mrf.mxu1 }
  0xe5   :  { %v531_v35 = vpop.f32.mrf.mxu0 }
  0xe6   :  { %v532_v36 = vadd.f32 %v531_v35, %v530_v32  ;;  %v553_v37 = vpop.f32.mrf.mxu1 }
  0xe7   :  { %v533_v38 = vpop.f32.mrf.mxu0  ;;  %v554_v40 = vadd.f32 %v553_v37, %v552_v33 }
  0xe8   :  { %v417_v39 = vadd.f32 %v532_v36, %v481_v34  ;;  %v555_v41 = vpop.f32.mrf.mxu1 }
  0xe9   :  { %v534_v42 = vpop.f32.mrf.mxu0 }
  0xea   :  { %v458_v43 = vadd.f32 %v554_v40, %v417_v39  ;;  %v535_v44 = vadd.f32 %v534_v42, %v533_v38  ;;  %v556_v45 = vpop.f32.mrf.mxu1 }
  0xeb   :  { %v557_v48 = vadd.f32 %v556_v45, %v555_v41 }
  0xec   :  { %v464_v46 = vsub.f32 0.0, %v458_v43  ;;  %v420_v47 = vadd.f32 %v535_v44, %v481_v34 }
  0xee   :  { %v466_v49 = vmul.f32 1.442695, %v464_v46  ;;  %v461_v50 = vadd.f32 %v557_v48, %v420_v47 }
  0xf0   :  { %590 = vpow2.f32 %v466_v49  ;;  %v465_v51 = vsub.f32 0.0, %v461_v50 }
  0xf2   :  { %v468_v52 = vmul.f32 1.442695, %v465_v51 }
  0xf4   :  { %592 = vpow2.f32 %v468_v52 }
  0xfd   :  { %v591_v53 = vpop.eup %590 }
  0xfe   :  { %v470_v54 = vadd.f32 1.0, %v591_v53 }
 0x100   :  { %594 = vrcp.f32 %v470_v54 }
 0x101   :  { %v593_v55 = vpop.eup %592 }
 0x102   :  { %v471_v56 = vadd.f32 1.0, %v593_v55 }
 0x104   :  { %596 = vrcp.f32 %v471_v56 }
 0x10d   :  { %v595_v57 = vpop.eup %594 }
 0x10e   :  { %474 = vst [vmem:[%s750_s4] sm:$0xff] %v595_v57 }
 0x111   :  { %v597_v58 = vpop.eup %596 }
 0x112   :  { %475 = vst [vmem:[%s750_s4 + $0x8] sm:$0xff] %v597_v58 }

</bundles_post_ra>
